<compile_context>
chip_gen: v7x
topology: tpu7x:2x2x1
jax: 0.10.0
libtpu: 0.0.40
codegen_flags: <defaults>
</compile_context>

<pallas_src>
import jax
import jax.numpy as jnp
from jax.experimental import pallas as pl
from jax.experimental.pallas import tpu as pltpu

NEG_PAD = -1e30  # column-tail fill (exp() underflows to 0, never produces NaN)


def _round_up(x, m):
    return ((x + m - 1) // m) * m


def _choose_tiles(B, C, sub):
    """Pick (tb, tc): ~4 MiB f32-equivalent logits blocks, prefer full-C rows."""
    budget_elems = (4 << 20) // 4                     # ~1M elements per block
    if C <= budget_elems:
        tc = C                                        # full row -> single-pass kernel
        max_tb = max(sub, ((budget_elems // C) // sub) * sub)
        if B < 16 and B <= max_tb:
            tb = B                                    # one exact block, no tail masking
        else:
            # >= 2 B tiles when possible so the "parallel" axis can shard (v7x megacore)
            tb = min(512, max_tb, _round_up(-(-B // 2), sub), _round_up(B, sub))
            tb = max(sub, tb)
    else:
        tc = 8192                                     # lane-dense C tiles, online LSE
        tb = max(sub, min(128, _round_up(B, sub)))
    return tb, tc


def _make_single_pass_kernel(B, tb, grid_b):
    """tc == C: one block per B tile; plain max / sum-exp / gather, no scratch."""
    needs_row_mask = (grid_b * tb != B)

    def kernel(x_ref, lab_ref, out_ref):
        x = x_ref[...].astype(jnp.float32)                      # (tb, C)
        lab = lab_ref[...]                                      # (tb, 1) int32
        col = jax.lax.broadcasted_iota(jnp.int32, x.shape, 1)
        m = jnp.max(x, axis=1, keepdims=True)                   # (tb, 1)
        se = jnp.sum(jnp.exp(x - m), axis=1, keepdims=True)     # (tb, 1)
        t = jnp.sum(jnp.where(col == lab, x, 0.0), axis=1, keepdims=True)
        nll = (m + jnp.log(se)) - t                              # (tb, 1)
        if needs_row_mask:
            row0 = pl.program_id(0) * tb
            rows = jax.lax.broadcasted_iota(jnp.int32, nll.shape, 0)
            nll = jnp.where(rows < (B - row0), nll, 0.0)
        psum = jnp.sum(nll, axis=0, keepdims=True)               # (1, 1)
        out_ref[...] = jnp.broadcast_to(psum.reshape(1, 1, 1), out_ref.shape)

    return kernel


def _make_tiled_kernel(B, tb, C, tc, grid_b):
    """C tiled: flash-style online logsumexp over the 'arbitrary' C axis."""
    needs_row_mask = (grid_b * tb != B)
    needs_col_mask = (C % tc != 0)

    def kernel(x_ref, lab_ref, out_ref, m_scr, l_scr, t_scr):
        ci = pl.program_id(1)

        @pl.when(ci == 0)
        def _():
            m_scr[...] = jnp.full_like(m_scr, -jnp.inf)
            l_scr[...] = jnp.zeros_like(l_scr)
            t_scr[...] = jnp.zeros_like(t_scr)

        x = x_ref[...].astype(jnp.float32)                       # (tb, tc)
        col = jax.lax.broadcasted_iota(jnp.int32, x.shape, 1)
        col0 = ci * tc
        if needs_col_mask:
            x = jnp.where(col < (C - col0), x, NEG_PAD)          # mask C tail

        # online logsumexp over C tiles
        m_prev = m_scr[...]
        m_new = jnp.maximum(m_prev, jnp.max(x, axis=1, keepdims=True))
        alpha = jnp.exp(m_prev - m_new)
        l_scr[...] = alpha * l_scr[...] + jnp.sum(jnp.exp(x - m_new), axis=1,
                                                  keepdims=True)
        m_scr[...] = m_new

        # label-logit gather for the columns owned by this C tile
        lab = lab_ref[...]                                       # (tb, 1)
        hit = col == (lab - col0)                                # offset on (tb,1) side
        t_scr[...] += jnp.sum(jnp.where(hit, x, 0.0), axis=1, keepdims=True)

        @pl.when(ci == pl.num_programs(1) - 1)
        def _():
            nll = (m_scr[...] + jnp.log(l_scr[...])) - t_scr[...]
            if needs_row_mask:
                row0 = pl.program_id(0) * tb
                rows = jax.lax.broadcasted_iota(jnp.int32, nll.shape, 0)
                nll = jnp.where(rows < (B - row0), nll, 0.0)
            psum = jnp.sum(nll, axis=0, keepdims=True)
            out_ref[...] = jnp.broadcast_to(psum.reshape(1, 1, 1), out_ref.shape)

    return kernel


def focal_loss(logits, target, gamma=0.0, eps=1e-7, *, tb=None, tc=None):
    """logits: (B, C) float (f32 or bf16), target: (B,) int.  Scalar focal loss."""
    del eps  # unused in the reference PyTorch forward as well
    B, C = logits.shape
    itemsize = jnp.dtype(logits.dtype).itemsize
    sub = max(8, 32 // max(1, itemsize))         # sublane align: f32->8, bf16->16

    auto_tb, auto_tc = _choose_tiles(B, C, sub)
    tb = auto_tb if tb is None else tb
    tc = auto_tc if tc is None else tc
    if tb != B:                                  # user/auto tiles must be sublane-aligned
        tb = max(sub, _round_up(min(tb, _round_up(B, sub)), sub))
    if tc != C:
        tc = max(128, _round_up(min(tc, _round_up(C, 128)), 128))
    grid_b = pl.cdiv(B, tb)
    grid_c = pl.cdiv(C, tc)

    lab2d = target.astype(jnp.int32).reshape(B, 1)

    cost = pl.CostEstimate(flops=6 * B * C,
                           transcendentals=B * C,
                           bytes_accessed=B * C * itemsize + B * 4)

    if grid_c == 1:
        kernel = _make_single_pass_kernel(B, tb, grid_b)
        partials = pl.pallas_call(
            kernel,
            out_shape=jax.ShapeDtypeStruct((grid_b, 8, 128), jnp.float32),
            grid_spec=pltpu.PrefetchScalarGridSpec(
                num_scalar_prefetch=0,
                grid=(grid_b,),
                in_specs=[pl.BlockSpec((tb, C), lambda bi: (bi, 0)),   # logits (native dtype)
                          pl.BlockSpec((tb, 1), lambda bi: (bi, 0))],  # labels
                out_specs=pl.BlockSpec((1, 8, 128), lambda bi: (bi, 0, 0)),
            ),
            compiler_params=pltpu.CompilerParams(
                dimension_semantics=("parallel",),
                vmem_limit_bytes=48 * 1024 * 1024),
            cost_estimate=cost,
        )(logits, lab2d)
    else:
        kernel = _make_tiled_kernel(B, tb, C, tc, grid_b)
        partials = pl.pallas_call(
            kernel,
            out_shape=jax.ShapeDtypeStruct((grid_b, 8, 128), jnp.float32),
            grid_spec=pltpu.PrefetchScalarGridSpec(
                num_scalar_prefetch=0,
                grid=(grid_b, grid_c),
                in_specs=[pl.BlockSpec((tb, tc), lambda bi, ci: (bi, ci)),
                          pl.BlockSpec((tb, 1), lambda bi, ci: (bi, 0))],
                out_specs=pl.BlockSpec((1, 8, 128), lambda bi, ci: (bi, 0, 0)),
                scratch_shapes=[pltpu.VMEM((tb, 1), jnp.float32)] * 3,  # m, l, label-logit
            ),
            compiler_params=pltpu.CompilerParams(
                dimension_semantics=("parallel", "arbitrary"),
                vmem_limit_bytes=48 * 1024 * 1024),
            cost_estimate=cost,
        )(logits, lab2d)

    # ~10-flop focal finalization in plain JAX (mean NLL -> focal reweighting).
    nll_sum = partials[:, 0, 0].sum()
    logp = nll_sum * (1.0 / B)
    p = jnp.exp(-logp)
    return (1.0 - p) ** gamma * logp


def _reference(logits, target, gamma):
    x = logits.astype(jnp.float32)
    logz = jax.scipy.special.logsumexp(x, axis=1)
    lab_logit = jnp.take_along_axis(x, target[:, None].astype(jnp.int32), axis=1)[:, 0]
    logp = jnp.mean(logz - lab_logit)
    p = jnp.exp(-logp)
    return (1.0 - p) ** gamma * logp


if __name__ == "__main__":
    key = jax.random.PRNGKey(0)
    ks = jax.random.split(key, 10)

    # Case A: forced tiled-C path (online logsumexp), multi-tile B, gamma = 2.
    B, C = 32, 384
    logits_a = 3.0 * jax.random.normal(ks[0], (B, C), dtype=jnp.float32)
    target_a = jax.random.randint(ks[1], (B,), 0, C, dtype=jnp.int32)
    out_a = jax.block_until_ready(focal_loss(logits_a, target_a, gamma=2.0, tb=16, tc=128))
    ref_a = _reference(logits_a, target_a, 2.0)
    assert jnp.allclose(out_a, ref_a, rtol=1e-4, atol=1e-4), (out_a, ref_a)

    # Case B: tiny non-aligned shapes, single exact block, default gamma = 0.
    B2, C2 = 10, 37
    logits_b = 2.0 * jax.random.normal(ks[2], (B2, C2), dtype=jnp.float32)
    target_b = jax.random.randint(ks[3], (B2,), 0, C2, dtype=jnp.int32)
    out_b = jax.block_until_ready(focal_loss(logits_b, target_b, gamma=0.0))
    ref_b = _reference(logits_b, target_b, 0.0)
    assert jnp.allclose(out_b, ref_b, rtol=1e-4, atol=1e-4), (out_b, ref_b)

    # Case C: auto tiles, B not a multiple of tb (exercises in-kernel row masking).
    B3, C3 = 20, 300
    logits_c = 2.5 * jax.random.normal(ks[4], (B3, C3), dtype=jnp.float32)
    target_c = jax.random.randint(ks[5], (B3,), 0, C3, dtype=jnp.int32)
    out_c = jax.block_until_ready(focal_loss(logits_c, target_c, gamma=1.5))
    ref_c = _reference(logits_c, target_c, 1.5)
    assert jnp.allclose(out_c, ref_c, rtol=1e-4, atol=1e-4), (out_c, ref_c)

    # Case D: native bf16 logits (no wrapper upcast pass), row-tail masking.
    B4, C4 = 24, 256
    logits_d = (2.0 * jax.random.normal(ks[6], (B4, C4), dtype=jnp.float32)).astype(jnp.bfloat16)
    target_d = jax.random.randint(ks[7], (B4,), 0, C4, dtype=jnp.int32)
    out_d = jax.block_until_ready(focal_loss(logits_d, target_d, gamma=2.0))
    ref_d = _reference(logits_d, target_d, 2.0)
    assert jnp.allclose(out_d, ref_d, rtol=1e-3, atol=1e-3), (out_d, ref_d)

    # Case E: tiled-C path with a ragged C tail (in-kernel column masking).
    B5, C5 = 16, 200
    logits_e = 2.0 * jax.random.normal(ks[8], (B5, C5), dtype=jnp.float32)
    target_e = jax.random.randint(ks[9], (B5,), 0, C5, dtype=jnp.int32)
    out_e = jax.block_until_ready(focal_loss(logits_e, target_e, gamma=2.0, tb=16, tc=128))
    ref_e = _reference(logits_e, target_e, 2.0)
    assert jnp.allclose(out_e, ref_e, rtol=1e-4, atol=1e-4), (out_e, ref_e)

    print("KERNEL_OK")
</pallas_src>

<mosaic_0001>
module attributes {stable_mosaic.version = 11 : i64} {
  func.func @kernel(%arg0: i32, %arg1: i32, %arg2: memref<16x128xf32, #tpu.memory_space<vmem>>, %arg3: memref<16x1xi32, #tpu.memory_space<vmem>>, %arg4: memref<1x8x128xf32, #tpu.memory_space<vmem>>, %arg5: memref<16x1xf32, #tpu.memory_space<vmem>>, %arg6: memref<16x1xf32, #tpu.memory_space<vmem>>, %arg7: memref<16x1xf32, #tpu.memory_space<vmem>>) attributes {dimension_semantics = [#tpu.dimension_semantics<parallel>, #tpu.dimension_semantics<arbitrary>], iteration_bounds = array<i64: 2, 3>, scalar_prefetch = 0 : i64, scratch_operands = 3 : i64, tpu.core_type = #tpu.core_type<tc>, window_params = [{transform_indices = @transform_0, window_bounds = array<i64: 16, 128>}, {transform_indices = @transform_1, window_bounds = array<i64: 16, 1>}, {transform_indices = @transform_2, window_bounds = array<i64: 1, 8, 128>}]} {
    %c0_i32 = arith.constant 0 : i32
    %0 = arith.cmpi eq, %arg1, %c0_i32 : i32
    %1 = arith.extui %0 : i1 to i32
    %c0_i32_0 = arith.constant 0 : i32
    %2 = arith.cmpi ne, %1, %c0_i32_0 : i32
    scf.if %2 {
      %cst_20 = arith.constant 0xFF800000 : f32
      %37 = vector.broadcast %cst_20 : f32 to vector<16x1xf32>
      %c0_21 = arith.constant 0 : index
      %c0_22 = arith.constant 0 : index
      %38 = vector.load %arg5[%c0_21, %c0_22] : memref<16x1xf32, #tpu.memory_space<vmem>>, vector<16x1xf32>
      tpu.vector_store %arg5[%c0_21, %c0_22], %37 {strides = array<i32>} : memref<16x1xf32, #tpu.memory_space<vmem>>, vector<16x1xf32>,
      %cst_23 = arith.constant 0.000000e+00 : f32
      %39 = vector.broadcast %cst_23 : f32 to vector<16x1xf32>
      %c0_24 = arith.constant 0 : index
      %c0_25 = arith.constant 0 : index
      %40 = vector.load %arg6[%c0_24, %c0_25] : memref<16x1xf32, #tpu.memory_space<vmem>>, vector<16x1xf32>
      tpu.vector_store %arg6[%c0_24, %c0_25], %39 {strides = array<i32>} : memref<16x1xf32, #tpu.memory_space<vmem>>, vector<16x1xf32>,
      %cst_26 = arith.constant 0.000000e+00 : f32
      %41 = vector.broadcast %cst_26 : f32 to vector<16x1xf32>
      %c0_27 = arith.constant 0 : index
      %c0_28 = arith.constant 0 : index
      %42 = vector.load %arg7[%c0_27, %c0_28] : memref<16x1xf32, #tpu.memory_space<vmem>>, vector<16x1xf32>
      tpu.vector_store %arg7[%c0_27, %c0_28], %41 {strides = array<i32>} : memref<16x1xf32, #tpu.memory_space<vmem>>, vector<16x1xf32>,
    } else {
    }
    %c0 = arith.constant 0 : index
    %c0_1 = arith.constant 0 : index
    %3 = vector.load %arg2[%c0, %c0_1] : memref<16x128xf32, #tpu.memory_space<vmem>>, vector<16x128xf32>
    %4 = tpu.iota {dimensions = array<i32: 1>} : vector<16x128xi32>
    %c128_i32 = arith.constant 128 : i32
    %5 = arith.muli %arg1, %c128_i32 : i32
    %c0_2 = arith.constant 0 : index
    %c0_3 = arith.constant 0 : index
    %6 = vector.load %arg5[%c0_2, %c0_3] : memref<16x1xf32, #tpu.memory_space<vmem>>, vector<16x1xf32>
    %cst = arith.constant dense<0xFF800000> : vector<16xf32>
    %7 = vector.multi_reduction <maximumf>, %3, %cst [1] : vector<16x128xf32> to vector<16xf32>
    %8 = vector.shape_cast %7 : vector<16xf32> to vector<16x1xf32>
    %9 = arith.maximumf %6, %8 : vector<16x1xf32>
    %10 = arith.subf %6, %9 : vector<16x1xf32>
    %11 = math.exp %10 : vector<16x1xf32>
    %c0_4 = arith.constant 0 : index
    %c0_5 = arith.constant 0 : index
    %12 = vector.load %arg6[%c0_4, %c0_5] : memref<16x1xf32, #tpu.memory_space<vmem>>, vector<16x1xf32>
    %13 = arith.mulf %11, %12 : vector<16x1xf32>
    %14 = vector.broadcast %9 : vector<16x1xf32> to vector<16x128xf32>
    %15 = arith.subf %3, %14 : vector<16x128xf32>
    %16 = math.exp %15 : vector<16x128xf32>
    %cst_6 = arith.constant dense<0.000000e+00> : vector<16xf32>
    %17 = vector.multi_reduction <add>, %16, %cst_6 [1] : vector<16x128xf32> to vector<16xf32>
    %18 = vector.shape_cast %17 : vector<16xf32> to vector<16x1xf32>
    %19 = arith.addf %13, %18 : vector<16x1xf32>
    %c0_7 = arith.constant 0 : index
    %c0_8 = arith.constant 0 : index
    %20 = vector.load %arg6[%c0_7, %c0_8] : memref<16x1xf32, #tpu.memory_space<vmem>>, vector<16x1xf32>
    tpu.vector_store %arg6[%c0_7, %c0_8], %19 {strides = array<i32>} : memref<16x1xf32, #tpu.memory_space<vmem>>, vector<16x1xf32>,
    %c0_9 = arith.constant 0 : index
    %c0_10 = arith.constant 0 : index
    %21 = vector.load %arg5[%c0_9, %c0_10] : memref<16x1xf32, #tpu.memory_space<vmem>>, vector<16x1xf32>
    tpu.vector_store %arg5[%c0_9, %c0_10], %9 {strides = array<i32>} : memref<16x1xf32, #tpu.memory_space<vmem>>, vector<16x1xf32>,
    %c0_11 = arith.constant 0 : index
    %c0_12 = arith.constant 0 : index
    %22 = vector.load %arg3[%c0_11, %c0_12] : memref<16x1xi32, #tpu.memory_space<vmem>>, vector<16x1xi32>
    %23 = vector.broadcast %5 : i32 to vector<16x1xi32>
    %24 = arith.subi %22, %23 : vector<16x1xi32>
    %25 = vector.broadcast %24 : vector<16x1xi32> to vector<16x128xi32>
    %26 = arith.cmpi eq, %4, %25 : vector<16x128xi32>
    %c0_13 = arith.constant 0 : index
    %c0_14 = arith.constant 0 : index
    %27 = vector.load %arg7[%c0_13, %c0_14] : memref<16x1xf32, #tpu.memory_space<vmem>>, vector<16x1xf32>
    %cst_15 = arith.constant 0.000000e+00 : f32
    %28 = vector.broadcast %cst_15 : f32 to vector<16x128xf32>
    %29 = arith.select %26, %3, %28 : vector<16x128xi1>, vector<16x128xf32>
    %cst_16 = arith.constant dense<0.000000e+00> : vector<16xf32>
    %30 = vector.multi_reduction <add>, %29, %cst_16 [1] : vector<16x128xf32> to vector<16xf32>
    %31 = vector.shape_cast %30 : vector<16xf32> to vector<16x1xf32>
    %32 = arith.addf %27, %31 : vector<16x1xf32>
    %c0_17 = arith.constant 0 : index
    %c0_18 = arith.constant 0 : index
    %33 = vector.load %arg7[%c0_17, %c0_18] : memref<16x1xf32, #tpu.memory_space<vmem>>, vector<16x1xf32>
    tpu.vector_store %arg7[%c0_17, %c0_18], %32 {strides = array<i32>} : memref<16x1xf32, #tpu.memory_space<vmem>>, vector<16x1xf32>,
    %c2_i32 = arith.constant 2 : i32
    %34 = arith.cmpi eq, %arg1, %c2_i32 : i32
    %35 = arith.extui %34 : i1 to i32
    %c0_i32_19 = arith.constant 0 : i32
    %36 = arith.cmpi ne, %35, %c0_i32_19 : i32
    scf.if %36 {
      %c0_20 = arith.constant 0 : index
      %c0_21 = arith.constant 0 : index
      %37 = vector.load %arg5[%c0_20, %c0_21] : memref<16x1xf32, #tpu.memory_space<vmem>>, vector<16x1xf32>
      %c0_22 = arith.constant 0 : index
      %c0_23 = arith.constant 0 : index
      %38 = vector.load %arg6[%c0_22, %c0_23] : memref<16x1xf32, #tpu.memory_space<vmem>>, vector<16x1xf32>
      %39 = math.log %38 : vector<16x1xf32>
      %40 = arith.addf %37, %39 : vector<16x1xf32>
      %c0_24 = arith.constant 0 : index
      %c0_25 = arith.constant 0 : index
      %41 = vector.load %arg7[%c0_24, %c0_25] : memref<16x1xf32, #tpu.memory_space<vmem>>, vector<16x1xf32>
      %42 = arith.subf %40, %41 : vector<16x1xf32>
      %cst_26 = arith.constant dense<0.000000e+00> : vector<1xf32>
      %43 = vector.multi_reduction <add>, %42, %cst_26 [0] : vector<16x1xf32> to vector<1xf32>
      %44 = vector.shape_cast %43 : vector<1xf32> to vector<1x1xf32>
      %45 = vector.shape_cast %44 : vector<1x1xf32> to vector<1x1x1xf32>
      %46 = vector.shape_cast %45 : vector<1x1x1xf32> to vector<1x1x1xf32>
      %47 = vector.broadcast %46 : vector<1x1x1xf32> to vector<1x8x128xf32>
      %c0_27 = arith.constant 0 : index
      %c0_28 = arith.constant 0 : index
      %c0_29 = arith.constant 0 : index
      %48 = vector.load %arg4[%c0_27, %c0_28, %c0_29] : memref<1x8x128xf32, #tpu.memory_space<vmem>>, vector<1x8x128xf32>
      tpu.vector_store %arg4[%c0_27, %c0_28, %c0_29], %47 {strides = array<i32>} : memref<1x8x128xf32, #tpu.memory_space<vmem>>, vector<1x8x128xf32>,
    } else {
    }
    return
  }
  func.func @transform_0(%arg0: i32, %arg1: i32) -> (i32, i32) {
    %c0_i32 = arith.constant 0 : i32
    return %arg0, %arg1 : i32, i32
  }
  func.func @transform_1(%arg0: i32, %arg1: i32) -> (i32, i32) {
    %c0_i32 = arith.constant 0 : i32
    %c0_i32_0 = arith.constant 0 : i32
    return %arg0, %c0_i32 : i32, i32
  }
  func.func @transform_2(%arg0: i32, %arg1: i32) -> (i32, i32, i32) {
    %c0_i32 = arith.constant 0 : i32
    %c0_i32_0 = arith.constant 0 : i32
    %c0_i32_1 = arith.constant 0 : i32
    return %arg0, %c0_i32, %c0_i32_0 : i32, i32, i32
  }
}

</mosaic_0001>

<bundles_post_ra>
// kernel: tpu_custom_call.1
= control target key start
LH: loop header
LB: loop body
LE: loop exit
PB: predicated region body
PF: predicated region fallthrough
CT: control target
= control target key end

     0   :  { %7 = vsyncpa [#allocation6], 0  ;;  %s993_s0 = inlined_call_operand.hbm [shape: f32[32,384], index: 0, kind: input, shape index: {}]   ;;  %s994_s1 = inlined_call_operand.vmem [shape: s32[32,1], index: 1, kind: input, shape index: {}]   ;;  %s995_s2 = inlined_call_operand.hbm [shape: f32[2,8,128], index: 2, kind: output, shape index: {}]  }
   0x1   :  { %9 = vsyncpa [#allocation6 + $0x1], 0 }
   0x2   :  { %10 = vsyncpa [#allocation7], 0 }
   0x3   :  { %12 = vsyncpa [#allocation7 + $0x1], 0  ;;  %s752_s9 = smov 0   ;;  %s754_s10 = smov 0  }
   0x4   :  { %s756_s11 = smov 0   ;;  %s758_s12 = smov 0  }
   0x5   :  { %s760_s13 = smov 0   ;;  %s762_s14 = smov 0  }
   0x6   :  { %s764_s15 = smov 0   ;;  %s766_s16 = smov 0  }
   0x7   :  { %s768_s17 = smov 0   ;;  %s770_s18 = smov 0  }
   0x8   :  { %s772_s19 = smov 0  }
   0x9 LB: > { %s429_s20 = sadd.s32 4294967295, %s726_s19   ;;  %s430_s21 = sadd.s32 4294967294, %s726_s19   ;;  %s726_s19 = sphi %s772_s19, %s18_s19   ;;  %s722_s18 = sphi %s770_s18, %s1016_s18   ;;  %s718_s17 = sphi %s768_s17, %s1015_s17   ;;  %s714_s16 = sphi %s766_s16, %s1014_s16   ;;  %s710_s15 = sphi %s764_s15, %s1013_s15   ;;  %s706_s14 = sphi %s762_s14, %s1012_s14   ;;  %s702_s13 = sphi %s760_s13, %s1011_s13   ;;  %s698_s12 = sphi %s758_s12, %s1010_s12   ;;  %s694_s11 = sphi %s756_s11, %s1009_s11   ;;  %s690_s10 = sphi %s754_s10, %s1008_s10   ;;  %s686_s9 = sphi %s752_s9, %s1007_s9  }
   0xa   : > { %s27_s22 = sadd.s32 1, %s718_s17  ;;  %s30_s23 = sadd.s32 1, %s722_s18 }
   0xb   : > { %p28_p0 = scmp.ge.s32.totalorder %s27_s22, 3  ;;  %s39_s24 = sadd.s32 1, %s706_s14 }
   0xc   : > { %p46_p1 = scmp.ne.s32.totalorder %s706_s14, %s702_s13  ;;  %p47_p2 = scmp.eq.s32.totalorder %s726_s19, 0 }
   0xd   : > { %s1018_s22 = smov (%p28_p0, %s27_s22), 0  ;;  %s1020_s23 = smov (!%p28_p0, %s30_s23), %s722_s18 }
   0xe   : > { %s35_s25 = ssub.s32 %s718_s17, %s1018_s22  ;;  %p818_p3 = por %p47_p2, %p46_p1 }
   0xf   : > { %p32_p4 = scmp.ge.s32.totalorder %s1020_s23, 2  ;;  %p52_p5 = scmp.ne.s32.totalorder %s702_s13, %s698_s12 }
  0x10   : > { %p53_p6 = scmp.eq.s32.totalorder %s429_s20, 0  ;;  %s91_s27 = sadd.s32 1, %s694_s11 }
  0x11   : > { %s1022_s23 = smov (%p32_p4, %s1020_s23), 0  ;;  %p101_p8 = scmp.ne.s32.totalorder %s694_s11, %s690_s10 }
  0x12   : > { %999 = sst [smem:[#allocation11_spill]] %s1022_s23  ;;  %p826_p7 = por %p53_p6, %p52_p5 }
  0x13   : > { %s34_s29 = ssub.s32 %s722_s18, %s1022_s23  ;;  %p102_p9 = scmp.eq.s32.totalorder %s429_s20, 5 }
  0x14   : > { %s36_s30 = sor.u32 %s35_s25, %s34_s29  ;;  %p89_p10 = scmp.eq.s32.totalorder %s34_s29, 0 }
  0x15   : > { %p37_p11 = scmp.eq.s32.totalorder %s36_s30, 0  ;;  %p834_p12 = por %p102_p9, %p101_p8 }
  0x16   : > { %s839_s4 = scalar_select %p89_p10, %s694_s11, %s91_s27  }
  0x17   : > { %s1001_s3 = scalar_select %p834_p12, 1, 0 }
  0x18   : > { %s842_s5 = scalar_select %p37_p11, %s706_s14, %s39_s24  }
  0x19   : > { %p107_p13 = scmp.ne.s32.totalorder %s690_s10, %s686_s9  ;;  %p108_p0 = scmp.eq.s32.totalorder %s430_s21, 5 }
  0x1a   : > { %p462_p1 = scmp.lt.s32.totalorder %s726_s19, 6  ;;  %s128_s7 = sand.u32 1, %s706_s14  }
  0x1b   : > { %p847_p2 = por %p108_p0, %p107_p13  ;;  %s433_s8 = sshll.u32 %s128_s7, 4 }
  0x1c   : > { %s449_s12 = smul.u32 6, %s722_s18  ;;  %s132_s20 = scalar_lea.vmem [#allocation5], %s433_s8 }
  0x1d   : > { %s1002_s6 = scalar_select %p847_p2, 1, 0 }
  0x1e   : > { %s141_s25 = sshll.u32 %s132_s20, 4  ;;  %p855_p4 = pnand %p462_p1, %p818_p3  ;;  %s860_s25 = int_to_ptr.vmem [resolvable:$true] %s141_s25 }
  0x1f   : > { %s138_s24 = sadd.s32 %s718_s17, %s449_s12  ;;  %s867_s26 = scalar_lea.sflag [#allocation6], %s128_s7 }
  0x20   : > { %s436_s21 = sshll.u32 %s138_s24, 7  ;;  %p576_p5 = pneg %p855_p4 }
  0x21   : > { %s865_s23 = scalar_lea.hbm %s993_s0, %s436_s21  ;;  %s579_s24 = scalar_lea.hbm %s993_s0, 1536 }
  0x22   : > { %s574_s8 = scalar_lea.hbm %s865_s23, 256  ;;  %p580_p9 = scmp.lt.u32.totalorder %s865_s23, %s993_s0 }
  0x23   : > { %p575_p3 = scmp.ne.s32.totalorder %s865_s23, %s574_s8  ;;  %p581_p10 = scmp.lt.u32.totalorder %s579_s24, %s574_s8 }
  0x24   : > { %p583_p13 = scmp.lt.u32.totalorder %s574_s8, %s865_s23 }
  0x25   : > { %p577_p6 = pnand %p576_p5, %p575_p3  ;;  %p582_p11 = por %p581_p10, %p580_p9 }
  0x27   : > { %p578_p8 = pneg %p577_p6  ;;  %p584_p0 = por %p583_p13, %p582_p11 }
  0x29   : > { %p585_p1 = pnand %p584_p0, %p578_p8 }
  0x2b   : > { %588 = shalt.err (!%p585_p1)
}
  0x2c   : > { %s589_s7 = scalar_lea.vmem %s860_s25, 256  ;;  %s728_s30 = smov [#allocation5]  }
  0x2d   : > { %p590_p3 = scmp.ne.s32.totalorder %s860_s25, %s589_s7  ;;  %s594_s12 = sshll.u32 %s728_s30, 4  ;;  %s595_s12 = int_to_ptr.vmem [resolvable:$false] %s594_s12 }
  0x2e   : > { %s596_s20 = scalar_lea.vmem %s595_s12, 512  ;;  %p597_p12 = scmp.lt.s32.totalorder %s860_s25, %s595_s12 }
  0x2f   : > { %p592_p6 = pnand %p590_p3, %p576_p5  ;;  %p598_p9 = scmp.lt.s32.totalorder %s596_s20, %s589_s7 }
  0x31   : > { %p593_p2 = pneg %p592_p6  ;;  %p599_p10 = por %p598_p9, %p597_p12 }
  0x33   : > { %p600_p11 = pnand %p599_p10, %p593_p2 }
  0x35   : > { %603 = shalt.err (!%p600_p11)
}
  0x36   : > { %s729_s8 = smov 384   ;;  %s730_s24 = smov 128  }
  0x37   : > { %s731_s21 = smov 8   ;;  %p437_p5 = scmp.ge.s32.totalorder %s726_s19, 1 }
  0x38   : > { %457 = dma.hbm_to_vmem [thread:$0]  (!%p855_p4), %s865_s23, 256, %s860_s25, %s867_s26, %s729_s8, %s730_s24, %s731_s21  }
  0x39   : > { %p158_p8 = scmp.lt.s32.totalorder %s726_s19, 7 }
  0x3b   : > { %p159_p13 = pnand %p437_p5, %p158_p8 }
  0x3c   : > { %s164_s27 = sand.u32 (!%p159_p13), 1, %s702_s13  }
  0x3d   : > { %162 = sbr.rel (%p159_p13) target bundleno = 710 (0x2c6), region = 28  ;;  %s438_s7 = sshll.u32 (!%p159_p13), %s164_s27, 4 }
  0x3e   : > { %s165_s30 = scalar_lea.sflag (!%p159_p13), [#allocation6], %s164_s27  ;;  %s168_s12 = scalar_lea.vmem (!%p159_p13), [#allocation5], %s438_s7 }
  0x44   : > { %677 = dma.done.wait (%p826_p7), %s165_s30, 256  }
  0x45   : > { %679 = vsyncadd (%p826_p7), %s165_s30, 4294967040  ;;  %s191_s29 = sand.u32 1, %s690_s10   ;;  %s440_s23 = sshll.u32 %s714_s16, 1 }
  0x46   : > { %s906_s25 = sshll.u32 %s191_s29, 3  ;;  %p196_p12 = scmp.lt.s32.totalorder %s440_s23, 3 }
  0x47   : > { %s193_s21 = scalar_lea.vmem [#allocation8], %s906_s25  ;;  %p442_p7 = scmp.ne.s32.totalorder %s710_s15, 0 }
  0x48   : > { %s1024_s23 = smov (!%p196_p12, %s440_s23), 3  ;;  %vm205_vm0 = vcmask (!%p442_p7), 7168   ;;  %v732_v0 = vmov (!%p442_p7), -inf   ;;  %v733_v1 = vmov (!%p442_p7), 0.0  }
  0x49   : > { %s441_s26 = sshll.u32 %s1024_s23, 3  ;;  %204 = sbr.rel (%p442_p7) target bundleno = 80 (0x50), region = 36  ;;  %206 = vst.msk [vmem:[#allocation2] sm:$0xff] (!%p442_p7), %vm205_vm0, %v732_v0  ;;  %207 = vst.msk [vmem:[#allocation2 + $0x8] sm:$0xff] (!%p442_p7), %vm205_vm0, %v732_v0 }
  0x4a   : > { %s911_s24 = scalar_lea.vmem %s994_s1, %s441_s26  ;;  %208 = vst.msk [vmem:[#allocation3] sm:$0xff] (!%p442_p7), %vm205_vm0, %v733_v1  ;;  %209 = vst.msk [vmem:[#allocation3 + $0x8] sm:$0xff] (!%p442_p7), %vm205_vm0, %v733_v1 }
  0x4b   : > { %210 = vst.msk [vmem:[#allocation4] sm:$0xff] (!%p442_p7), %vm205_vm0, %v733_v1  ;;  %211 = vst.msk [vmem:[#allocation4 + $0x8] sm:$0xff] (!%p442_p7), %vm205_vm0, %v733_v1 }
  0x50 PF: > { %v212_v2 = vld [vmem:[%s168_s12] sm:$0xff]  ;;  %v213_v3 = vld [vmem:[%s168_s12 + $0x8] sm:$0xff]  ;;  %v734_v4 = vmov 0   ;;  %s443_s28 = sshll.u32 %s710_s15, 7  ;;  %vm257_vm1 = vcmask 7168   ;;  %v214_v18 = vlaneseq  ;;  %p444_p2 = scmp.ne.s32.totalorder %s710_s15, 2 }
  0x51   : > { %219 = vmax.xlane.f32.xlu0 %v212_v2  ;;  %559 = vset.pattern.permute.xlu1 %v734_v4  ;;  %v264_v5 = vstv %s443_s28  ;;  %v262_v6 = vld [vmem:[%s911_s24] sm:$0xff]  ;;  %v218_v11 = vld [vmem:[#allocation2 + $0x8] sm:$0xff]  ;;  %v231_v38 = vld [vmem:[#allocation3] sm:$0xff]  ;;  %v735_v51 = vmov (!%p444_p2), 0  }
  0x52   : > { %560 = vset.pattern.permute.xlu0 %v734_v4  ;;  %v265_v7 = vsub.s32 %v262_v6, %v264_v5  ;;  %v217_v8 = vld [vmem:[#allocation2] sm:$0xff]  ;;  %v263_v14 = vld [vmem:[%s911_s24 + $0x8] sm:$0xff]  ;;  %v215_v19 = vand.u32 127, %v214_v18  ;;  %v232_v42 = vld [vmem:[#allocation3 + $0x8] sm:$0xff] }
  0x53   : > { %v266_v17 = vsub.s32 %v263_v14, %v264_v5  ;;  %v275_v32 = vld [vmem:[#allocation4] sm:$0xff]  ;;  %v276_v47 = vld [vmem:[#allocation4 + $0x8] sm:$0xff] }
  0x55   : > { %221 = vmax.xlane.f32.xlu0 %v213_v3 }
  0x6b   : > { %268 = vperm.xlu0 %560, %v265_v7  }
  0x6f   : > { %569 = vset.pattern.permute.xlu0 (!%p444_p2), %v735_v51 }
  0xde   : > { %v220_v9 = vpop.xlane.xlu0 %219 }
  0xdf   : > { %v223_v10 = vmax.f32 %v217_v8, %v220_v9 }
  0xe1   : > { %v225_v12 = vsub.f32 %v217_v8, %v223_v10  ;;  %260 = vst.msk [vmem:[#allocation2] sm:$0xff] %vm257_vm1, %v223_v10  ;;  %237 = vperm.xlu1 %559, %v223_v10  }
  0xe2   : > { %v222_v13 = vpop.xlane.xlu0 %221 }
  0xe3   : > { %v224_v15 = vmax.f32 %v218_v11, %v222_v13  ;;  %v227_v35 = vmul.f32 1.442695, %v225_v12 }
  0xe5   : > { %v226_v16 = vsub.f32 %v218_v11, %v224_v15  ;;  %261 = vst.msk [vmem:[#allocation2 + $0x8] sm:$0xff] %vm257_vm1, %v224_v15  ;;  %242 = vperm.xlu1 %559, %v224_v15  }
  0xe7   : > { %v229_v36 = vmul.f32 1.442695, %v226_v16 }
  0xe8   : > { %v291_v54 = vld [vmem:[#allocation2] sm:$0xff] (!%p444_p2) }
  0xe9   : > { %271 = vperm.xlu1 %559, %v266_v17  }
  0xea   : > { %v269_v20 = vpop.permute.xlu0 %268 }
  0xeb   : > { %vm273_vm2 = vcmp.eq.s32.totalorder %v215_v19, %v269_v20 }
  0xec   : > { %v277_v21 = vsel %vm273_vm2, %v212_v2, 0.0  ;;  %v292_v56 = vld [vmem:[#allocation2 + $0x8] sm:$0xff] (!%p444_p2) }
  0xed   : > { %279 = vadd.xlane.f32.xlu0 %v277_v21 }
 0x160   : > { %v238_v22 = vpop.permute.xlu1 %237 }
 0x161   : > { %v245_v23 = vsub.f32 %v212_v2, %v238_v22 }
 0x163   : > { %v247_v24 = vmul.f32 1.442695, %v245_v23 }
 0x164   : > { %v243_v25 = vpop.permute.xlu1 %242 }
 0x165   : > { %561 = vpow2.f32 %v247_v24  ;;  %v246_v26 = vsub.f32 %v213_v3, %v243_v25 }
 0x167   : > { %v249_v27 = vmul.f32 1.442695, %v246_v26 }
 0x168   : > { %v272_v29 = vpop.permute.xlu1 %271 }
 0x169   : > { %563 = vpow2.f32 %v249_v27  ;;  %vm274_vm3 = vcmp.eq.s32.totalorder %v215_v19, %v272_v29 }
 0x16a   : > { %v278_v31 = vsel %vm274_vm3, %v213_v3, 0.0  ;;  %565 = vpow2.f32 %v227_v35 }
 0x16b   : > { %567 = vpow2.f32 %v229_v36 }
 0x16f   : > { %v562_v28 = vpop.eup %561 }
 0x170   : > { %251 = vadd.xlane.f32.xlu1 %v562_v28 }
 0x173   : > { %v564_v30 = vpop.eup %563 }
 0x174   : > { %253 = vadd.xlane.f32.xlu1 %v564_v30  ;;  %v566_v37 = vpop.eup %565 }
 0x175   : > { %v233_v39 = vmul.f32 %v566_v37, %v231_v38  ;;  %v568_v40 = vpop.eup %567 }
 0x176   : > { %v234_v44 = vmul.f32 %v568_v40, %v232_v42 }
 0x178   : > { %281 = vadd.xlane.f32.xlu1 %v278_v31 }
 0x17a   : > { %v280_v33 = vpop.xlane.xlu0 %279 }
 0x17b   : > { %v283_v34 = vadd.f32 %v280_v33, %v275_v32 }
 0x17d   : > { %285 = vst.msk [vmem:[#allocation4] sm:$0xff] %vm257_vm1, %v283_v34 }
 0x184   : > { %v301_v59 = vld [vmem:[#allocation4] sm:$0xff] (!%p444_p2) }
 0x1fd   : > { %v252_v41 = vpop.xlane.xlu1 %251 }
 0x1fe   : > { %v255_v43 = vadd.f32 %v252_v41, %v233_v39 }
 0x200   : > { %258 = vst.msk [vmem:[#allocation3] sm:$0xff] %vm257_vm1, %v255_v43 }
 0x201   : > { %v254_v45 = vpop.xlane.xlu1 %253 }
 0x202   : > { %v256_v46 = vadd.f32 %v254_v45, %v234_v44  ;;  %290 = sbr.rel (%p444_p2) target bundleno = 685 (0x2ad), region = 40 }
 0x204   : > { %259 = vst.msk [vmem:[#allocation3 + $0x8] sm:$0xff] %vm257_vm1, %v256_v46 }
 0x205   : > { %v282_v48 = vpop.xlane.xlu1 %281 }
 0x206   : > { %v284_v49 = vadd.f32 %v282_v48, %v276_v47 }
 0x207   : > { %v293_v50 = vld [vmem:[#allocation3] sm:$0xff] (!%p444_p2) }
 0x208   : > { %286 = vst.msk [vmem:[#allocation4 + $0x8] sm:$0xff] %vm257_vm1, %v284_v49  ;;  %570 = vlog2.f32 (!%p444_p2), %v293_v50 }
 0x20b   : > { %v294_v52 = vld [vmem:[#allocation3 + $0x8] sm:$0xff] }
 0x20c   : > { %572 = vlog2.f32 %v294_v52 }
 0x20f   : > { %v302_v61 = vld [vmem:[#allocation4 + $0x8] sm:$0xff] }
 0x212   : > { %v571_v53 = vpop.eup %570 }
 0x213   : > { %v296_v57 = vmul.f32 0.6931472, %v571_v53 }
 0x215   : > { %v299_v60 = vadd.f32 %v296_v57, %v291_v54 }
 0x216   : > { %v573_v55 = vpop.eup %572 }
 0x217   : > { %v298_v58 = vmul.f32 0.6931472, %v573_v55  ;;  %v303_v63 = vsub.f32 %v299_v60, %v301_v59 }
 0x219   : > { %v300_v62 = vadd.f32 %v298_v58, %v292_v56  ;;  %v305_v1 = vsel %vm257_vm1, %v303_v63, 0.0 }
 0x21b   : > { %v304_v0 = vsub.f32 %v300_v62, %v302_v61 }
 0x21d   : > { %v306_v2 = vsel %vm257_vm1, %v304_v0, 0.0 }
 0x21e   : > { %v307_v3 = vadd.f32 %v306_v2, %v305_v1 }
 0x220   : > { %v308_v4 = vrot.slane %v307_v3, 4 }
 0x222   : > { %v309_v5 = vadd.f32 %v308_v4, %v307_v3 }
 0x224   : > { %v310_v6 = vrot.slane %v309_v5, 2 }
 0x226   : > { %v311_v7 = vadd.f32 %v310_v6, %v309_v5 }
 0x228   : > { %v312_v8 = vrot.slane %v311_v7, 1 }
 0x22a   : > { %v313_v9 = vadd.f32 %v312_v8, %v311_v7 }
 0x22c   : > { %316 = vperm.xlu0 %569, %v313_v9  }
 0x2ab   : > { %v317_v10 = vpop.permute.xlu0 %316 }
 0x2ac   : > { %319 = vst [vmem:[%s193_s21] sm:$0xff] %v317_v10 }
 0x2ad PF: > { %s446_s15 = sshll.u32 %s714_s16, 7  ;;  %s334_s12 = sshll.u32 %s193_s21, 4  ;;  %s335_s12 = int_to_ptr.vmem [resolvable:$true] %s334_s12 }
 0x2ae   : > { %s933_s30 = scalar_lea.hbm %s995_s2, %s446_s15  ;;  %s321_s23 = scalar_lea.sflag [#allocation7], %s191_s29 }
 0x2af   : > { %s604_s26 = scalar_lea.vmem %s335_s12, 128  ;;  %p1004_p0 = scmp.ne.s32.totalorder %s1001_s3, 0 }
 0x2b0   : > { %p605_p4 = scmp.ne.s32.totalorder %s335_s12, %s604_s26  ;;  %s736_s20 = smov [#allocation8]  }
 0x2b1   : > { %s608_s8 = sshll.u32 %s736_s20, 4  ;;  %s609_s8 = int_to_ptr.vmem [resolvable:$false] %s608_s8 }
 0x2b2   : > { %p606_p1 = pnand %p605_p4, %p1004_p0  ;;  %s610_s24 = scalar_lea.vmem %s609_s8, 256 }
 0x2b3   : > { %p611_p6 = scmp.lt.s32.totalorder %s335_s12, %s609_s8  ;;  %p612_p9 = scmp.lt.s32.totalorder %s610_s24, %s604_s26 }
 0x2b4   : > { %p607_p3 = pneg %p606_p1 }
 0x2b5   : > { %p613_p10 = por %p612_p9, %p611_p6 }
 0x2b7   : > { %p614_p11 = pnand %p613_p10, %p607_p3 }
 0x2b9   : > { %617 = shalt.err (!%p614_p11)
}
 0x2ba   : > { %s618_s16 = scalar_lea.hbm %s933_s30, 128  ;;  %s622_s21 = scalar_lea.hbm %s995_s2, 256 }
 0x2bb   : > { %p619_p5 = scmp.ne.s32.totalorder %s933_s30, %s618_s16  ;;  %p623_p12 = scmp.lt.u32.totalorder %s933_s30, %s995_s2 }
 0x2bc   : > { %p624_p7 = scmp.lt.u32.totalorder %s622_s21, %s618_s16  ;;  %p626_p4 = scmp.lt.u32.totalorder %s618_s16, %s933_s30 }
 0x2bd   : > { %p620_p8 = pnand %p619_p5, %p1004_p0 }
 0x2be   : > { %p625_p2 = por %p624_p7, %p623_p12 }
 0x2bf   : > { %p621_p13 = pneg %p620_p8 }
 0x2c0   : > { %p627_p1 = por %p626_p4, %p625_p2 }
 0x2c2   : > { %p628_p3 = pnand %p627_p1, %p621_p13 }
 0x2c4   : > { %631 = shalt.err (!%p628_p3)
}
 0x2c5   : > { %452 = dma.vmem_to_hbm [thread:$0]  (%p1004_p0), %s335_s12, 128, %s933_s30, %s321_s23  }
 0x2c6 PF: > { %p463_p6 = scmp.ge.s32.totalorder %s726_s19, 2  ;;  %s346_s27 = sand.u32 1, %s686_s9  }
 0x2c7   : > { %p1005_p9 = scmp.ne.s32.totalorder %s1002_s6, 0  ;;  %s347_s7 = scalar_lea.sflag [#allocation7], %s346_s27 }
 0x2c9   : > { %p459_p10 = pnand %p463_p6, %p1005_p9 }
 0x2cb   : > { %681 = dma.done.wait (!%p459_p10), %s347_s7, 128  }
 0x2cc   : > { %683 = vsyncadd (!%p459_p10), %s347_s7, 4294967168  ;;  %s18_s19 = sadd.s32 1, %s726_s19   ;;  %s1006_s3 = sld [smem:[#allocation11_spill]] }
 0x2cd   : > { %p15_p11 = scmp.ge.s32.totalorder %s18_s19, 8   ;;  %s1007_s9 = smov %s690_s10 }
 0x2ce   : > { %s1008_s10 = smov %s694_s11  ;;  %s1009_s11 = smov %s839_s4 }
 0x2cf   : > { %s1010_s12 = smov %s702_s13  ;;  %s1011_s13 = smov %s706_s14 }
 0x2d0   : > { %s1012_s14 = smov %s842_s5  ;;  %s1013_s15 = smov %s718_s17 }
 0x2d1   : > { %s1014_s16 = smov %s722_s18  ;;  %s1015_s17 = smov %s1018_s22 }
 0x2d2   : > { %s1016_s18 = smov %s1006_s3  ;;  %17 = sbr.rel (!%p15_p11) target bundleno = 9 (0x9), region = 84 }
 0x2d9   :  { %352 = vsyncpa [#allocation6], 1 }
 0x2da   :  { %354 = vsyncpa [#allocation6 + $0x1], 1 }
 0x2db   :  { %355 = vsyncpa [#allocation7], 1 }
 0x2dc   :  { %357 = vsyncpa [#allocation7 + $0x1], 1 }

</bundles_post_ra>
